<compile_context>
chip_gen: v7x
topology: tpu7x:2x2x1
jax: 0.10.0
libtpu: 0.0.40
codegen_flags: <defaults>
</compile_context>

<pallas_src>
import math

import jax
import jax.numpy as jnp
from jax.experimental import pallas as pl
from jax.experimental.pallas import tpu as pltpu

_NEG_BIG = -1e30  # finite "-inf": avoids (-inf) - (-inf) = nan in the max


def _round_up(v, m):
    return ((v + m - 1) // m) * m


def _pad128(v):
    return _round_up(v, 128)


# -----------------------------------------------------------------------------
# Kernel A: node features resident in VMEM, grid = (processing_steps,)
# -----------------------------------------------------------------------------
def _set2set_resident_kernel(ids_ref, x_hbm, wih_ref, whh_ref, b_ref, out_ref,
                             xv_sc, h_sc, c_sc, qstar_sc):
    B, C = h_sc.shape
    s = pl.program_id(0)

    @pl.when(s == 0)
    def _init():
        h_sc[...] = jnp.zeros_like(h_sc)
        c_sc[...] = jnp.zeros_like(c_sc)
        qstar_sc[...] = jnp.zeros_like(qstar_sc)
        # one-time HBM -> VMEM copy of x, reused by all processing steps
        pltpu.sync_copy(x_hbm, xv_sc)

    # ---- LSTM cell (PyTorch gate order i, f, g, o); bf16 MXU, f32 accum ----
    gates = (jnp.dot(qstar_sc[...].astype(jnp.bfloat16), wih_ref[...],
                     preferred_element_type=jnp.float32)
             + jnp.dot(h_sc[...].astype(jnp.bfloat16), whh_ref[...],
                       preferred_element_type=jnp.float32)
             + b_ref[...])
    i_g = jax.nn.sigmoid(gates[:, 0 * C:1 * C])
    f_g = jax.nn.sigmoid(gates[:, 1 * C:2 * C])
    g_g = jnp.tanh(gates[:, 2 * C:3 * C])
    o_g = jax.nn.sigmoid(gates[:, 3 * C:4 * C])
    c_new = f_g * c_sc[...] + i_g * g_g
    h_new = o_g * jnp.tanh(c_new)
    c_sc[...] = c_new
    h_sc[...] = h_new

    # ---- segment softmax + readout over the whole (resident) node set ------
    x_v = xv_sc[...]                                          # (Np, C) bf16
    n_pad = x_v.shape[0]
    ids = ids_ref[...]                                        # (1, Np) int32
    seg = ids == jax.lax.broadcasted_iota(jnp.int32, (B, n_pad), 0)
    q_bf = h_new.astype(jnp.bfloat16)
    e = jnp.einsum('bc,nc->bn', q_bf, x_v,
                   preferred_element_type=jnp.float32)        # (B, Np)
    e = jnp.where(seg, e, _NEG_BIG)
    mx = jnp.max(e, axis=1, keepdims=True)                    # (B, 1)
    p = jnp.where(seg, jnp.exp(e - mx), 0.0)                  # (B, Np)
    den = jnp.sum(p, axis=1, keepdims=True)                   # (B, 1)
    r = jnp.dot(p.astype(jnp.bfloat16), x_v,
                preferred_element_type=jnp.float32) / (den + 1e-16)   # (B, C)
    q_star = jnp.concatenate([h_new, r], axis=-1)             # (B, 2C)
    qstar_sc[...] = q_star
    out_ref[...] = q_star


# -----------------------------------------------------------------------------
# Kernel B: streaming node tiles, grid = (processing_steps, n_tiles)
# -----------------------------------------------------------------------------
def _set2set_stream_kernel(ids_ref, x_ref, wih_ref, whh_ref, b_ref, out_ref,
                           h_sc, c_sc, qstar_sc, mx_sc, den_sc, racc_sc):
    B, C = h_sc.shape
    s = pl.program_id(0)
    n = pl.program_id(1)
    n_last = pl.num_programs(1) - 1

    @pl.when(jnp.logical_and(s == 0, n == 0))
    def _init():
        h_sc[...] = jnp.zeros_like(h_sc)
        c_sc[...] = jnp.zeros_like(c_sc)
        qstar_sc[...] = jnp.zeros_like(qstar_sc)

    @pl.when(n == 0)
    def _lstm_cell():
        gates = (jnp.dot(qstar_sc[...].astype(jnp.bfloat16), wih_ref[...],
                         preferred_element_type=jnp.float32)
                 + jnp.dot(h_sc[...].astype(jnp.bfloat16), whh_ref[...],
                           preferred_element_type=jnp.float32)
                 + b_ref[...])
        i_g = jax.nn.sigmoid(gates[:, 0 * C:1 * C])
        f_g = jax.nn.sigmoid(gates[:, 1 * C:2 * C])
        g_g = jnp.tanh(gates[:, 2 * C:3 * C])
        o_g = jax.nn.sigmoid(gates[:, 3 * C:4 * C])
        c_new = f_g * c_sc[...] + i_g * g_g
        h_new = o_g * jnp.tanh(c_new)
        c_sc[...] = c_new
        h_sc[...] = h_new
        # reset the per-step online-softmax accumulators
        mx_sc[...] = jnp.full_like(mx_sc, _NEG_BIG)
        den_sc[...] = jnp.zeros_like(den_sc)
        racc_sc[...] = jnp.zeros_like(racc_sc)

    # ---- every tile: online (running-max) segment-softmax accumulation -----
    x_t = x_ref[...]                                          # (TILE_N, C) bf16
    tile = x_t.shape[0]
    ids = ids_ref[...]                                        # (1, TILE_N)
    seg = ids == jax.lax.broadcasted_iota(jnp.int32, (B, tile), 0)
    q_bf = h_sc[...].astype(jnp.bfloat16)
    e = jnp.einsum('bc,nc->bn', q_bf, x_t,
                   preferred_element_type=jnp.float32)        # (B, TILE_N)
    e = jnp.where(seg, e, _NEG_BIG)

    mx_old = mx_sc[...]                                       # (B, 1)
    new_max = jnp.maximum(mx_old, jnp.max(e, axis=1, keepdims=True))
    alpha = jnp.exp(mx_old - new_max)                         # (B, 1)
    p = jnp.where(seg, jnp.exp(e - new_max), 0.0)             # (B, TILE_N)

    mx_sc[...] = new_max
    den_sc[...] = alpha * den_sc[...] + jnp.sum(p, axis=1, keepdims=True)
    r_tile = jnp.dot(p.astype(jnp.bfloat16), x_t,
                     preferred_element_type=jnp.float32)      # (B, C)
    racc_sc[...] = alpha * racc_sc[...] + r_tile

    @pl.when(n == n_last)
    def _finalize():
        r = racc_sc[...] / (den_sc[...] + 1e-16)              # exact divide
        q_star = jnp.concatenate([h_sc[...], r], axis=-1)     # (B, 2C)
        qstar_sc[...] = q_star
        out_ref[...] = q_star


# -----------------------------------------------------------------------------
# Wrapper
# -----------------------------------------------------------------------------
def set2set_pallas(x, batch, batch_size, w_ih, w_hh, b_ih, b_hh,
                   processing_steps, num_layers=1, tile_n=2048,
                   force_stream=False):
    """x: (N, C) float, batch: (N,) int graph ids, LSTM weights PyTorch layout."""
    # TODO(synk): stacked LSTM (num_layers > 1) not implemented in the kernel.
    assert num_layers == 1, "only the single-layer LSTM case is implemented"
    steps = int(processing_steps)
    assert steps >= 1
    N, C = x.shape
    B = int(batch_size)
    B_pad = _round_up(B, 8)

    # LSTM weights, PyTorch layout -> transposed bf16 operands (f32 accum)
    wih_t = jnp.transpose(w_ih).astype(jnp.bfloat16)          # (2C, 4C)
    whh_t = jnp.transpose(w_hh).astype(jnp.bfloat16)          # (C, 4C)
    bias = (b_ih + b_hh).astype(jnp.float32).reshape(1, 4 * C)

    try:
        vmem_cap = int(pltpu.get_tpu_info().vmem_capacity_bytes)
    except Exception:            # conservative fallback (v7x-sized VMEM)
        vmem_cap = 64 * 2 ** 20
    budget = int(0.6 * vmem_cap)

    # Padded (lane=128 / sublane=8,16) VMEM byte estimates.
    weights_bytes = (2 * (_round_up(2 * C, 16) + _round_up(C, 16))
                     * _pad128(4 * C) * 2
                     + 2 * 8 * _pad128(4 * C) * 4)
    state_bytes = (2 * B_pad * _pad128(C) + B_pad * _pad128(2 * C)
                   + 2 * B_pad * _pad128(2 * C) + B_pad * _pad128(4 * C)) * 4

    # ---------------- resident-x path (x cached in VMEM once) ----------------
    n_res = _round_up(N, 16)
    resident_bytes = (n_res * _pad128(C) * 2                  # resident x (bf16)
                      + 2 * 8 * _pad128(n_res) * 4            # ids (1, N) int32
                      + 4 * B_pad * _pad128(n_res) * 4        # e/p/seg f32 temps
                      + weights_bytes + state_bytes)
    use_resident = (not force_stream) and resident_bytes <= budget

    if use_resident:
        n_pad = n_res
        ids = jnp.pad(batch.astype(jnp.int32), (0, n_pad - N),
                      constant_values=B).reshape(1, n_pad)
        x_bf = jnp.pad(x.astype(jnp.bfloat16), ((0, n_pad - N), (0, 0)))
        vmem_limit = int(min(max(2 * resident_bytes, 32 * 2 ** 20),
                             int(0.9 * vmem_cap)))
        grid_spec = pltpu.PrefetchScalarGridSpec(
            num_scalar_prefetch=0,
            grid=(steps,),
            in_specs=[
                pl.BlockSpec((1, n_pad), lambda s: (0, 0)),        # segment ids
                pl.BlockSpec(memory_space=pl.ANY),                 # x stays HBM
                pl.BlockSpec((2 * C, 4 * C), lambda s: (0, 0)),    # W_ih^T
                pl.BlockSpec((C, 4 * C), lambda s: (0, 0)),        # W_hh^T
                pl.BlockSpec((1, 4 * C), lambda s: (0, 0)),        # bias
            ],
            out_specs=pl.BlockSpec((B, 2 * C), lambda s: (0, 0)),
            scratch_shapes=[
                pltpu.VMEM((n_pad, C), jnp.bfloat16),   # resident node features
                pltpu.VMEM((B, C), jnp.float32),        # h
                pltpu.VMEM((B, C), jnp.float32),        # c
                pltpu.VMEM((B, 2 * C), jnp.float32),    # q_star
            ],
        )
        return pl.pallas_call(
            _set2set_resident_kernel,
            grid_spec=grid_spec,
            out_shape=jax.ShapeDtypeStruct((B, 2 * C), jnp.float32),
            compiler_params=pltpu.CompilerParams(
                dimension_semantics=("arbitrary",),
                vmem_limit_bytes=vmem_limit),
        )(ids, x_bf, wih_t, whh_t, bias)

    # ---------------- streaming path (x re-read every step) ------------------
    # TODO(synk): v7x could split the node-tile axis across its 2 TensorCores
    # (per-core partial accumulators + cross-core combine); not implemented.
    tile = _round_up(min(int(tile_n), _round_up(N, 128)), 128)
    n_pad = _round_up(N, tile)
    n_tiles = n_pad // tile
    ids = jnp.pad(batch.astype(jnp.int32), (0, n_pad - N),
                  constant_values=B).reshape(1, n_pad)
    x_bf = jnp.pad(x.astype(jnp.bfloat16), ((0, n_pad - N), (0, 0)))
    stream_bytes = (2 * _round_up(tile, 16) * _pad128(C) * 2     # x tiles (2 buf)
                    + 2 * 8 * _pad128(tile) * 4                  # ids tiles
                    + 4 * B_pad * _pad128(tile) * 4              # e/p/seg temps
                    + weights_bytes + state_bytes
                    + 3 * B_pad * _pad128(C) * 4)                # mx/den/racc
    vmem_limit = int(min(max(2 * stream_bytes, 32 * 2 ** 20),
                         int(0.9 * vmem_cap)))
    grid_spec = pltpu.PrefetchScalarGridSpec(
        num_scalar_prefetch=0,
        grid=(steps, n_tiles),
        in_specs=[
            pl.BlockSpec((1, tile), lambda s, n: (0, n)),          # segment ids
            pl.BlockSpec((tile, C), lambda s, n: (n, 0)),          # node features
            pl.BlockSpec((2 * C, 4 * C), lambda s, n: (0, 0)),     # W_ih^T
            pl.BlockSpec((C, 4 * C), lambda s, n: (0, 0)),         # W_hh^T
            pl.BlockSpec((1, 4 * C), lambda s, n: (0, 0)),         # bias
        ],
        out_specs=pl.BlockSpec((B, 2 * C), lambda s, n: (0, 0)),
        scratch_shapes=[
            pltpu.VMEM((B, C), jnp.float32),        # h
            pltpu.VMEM((B, C), jnp.float32),        # c
            pltpu.VMEM((B, 2 * C), jnp.float32),    # q_star
            pltpu.VMEM((B, 1), jnp.float32),        # running max
            pltpu.VMEM((B, 1), jnp.float32),        # running denom
            pltpu.VMEM((B, C), jnp.float32),        # weighted-sum accumulator
        ],
    )
    return pl.pallas_call(
        _set2set_stream_kernel,
        grid_spec=grid_spec,
        out_shape=jax.ShapeDtypeStruct((B, 2 * C), jnp.float32),
        compiler_params=pltpu.CompilerParams(
            dimension_semantics=("arbitrary", "arbitrary"),
            vmem_limit_bytes=vmem_limit),
    )(ids, x_bf, wih_t, whh_t, bias)


def set2set_ref(x, batch, batch_size, w_ih, w_hh, b_ih, b_hh, steps):
    """Pure-JAX f32 reference mirroring the PyTorch module."""
    N, C = x.shape
    B = int(batch_size)
    h = jnp.zeros((B, C), jnp.float32)
    c = jnp.zeros((B, C), jnp.float32)
    q_star = jnp.zeros((B, 2 * C), jnp.float32)
    for _ in range(steps):
        gates = q_star @ w_ih.T + h @ w_hh.T + b_ih + b_hh
        i_g = jax.nn.sigmoid(gates[:, :C])
        f_g = jax.nn.sigmoid(gates[:, C:2 * C])
        g_g = jnp.tanh(gates[:, 2 * C:3 * C])
        o_g = jax.nn.sigmoid(gates[:, 3 * C:])
        c = f_g * c + i_g * g_g
        h = o_g * jnp.tanh(c)
        q = h
        e = jnp.sum(x * q[batch], axis=-1)
        e_max = jax.ops.segment_max(e, batch, num_segments=B)
        exp_e = jnp.exp(e - e_max[batch])
        denom = jax.ops.segment_sum(exp_e, batch, num_segments=B)
        a = exp_e / (denom[batch] + 1e-16)
        r = jax.ops.segment_sum(a[:, None] * x, batch, num_segments=B)
        q_star = jnp.concatenate([q, r], axis=-1)
    return q_star


if __name__ == "__main__":
    in_channels = 32          # C
    processing_steps = 3
    num_layers = 1            # kernel implements the single-layer case

    key = jax.random.PRNGKey(0)
    kx, k1, k2, k3, k4, kx2 = jax.random.split(key, 6)

    # PyTorch nn.LSTM(2C, C, 1) reset_parameters(): U(-1/sqrt(C), 1/sqrt(C))
    bound = 1.0 / math.sqrt(in_channels)
    w_ih = jax.random.uniform(k1, (4 * in_channels, 2 * in_channels),
                              minval=-bound, maxval=bound, dtype=jnp.float32)
    w_hh = jax.random.uniform(k2, (4 * in_channels, in_channels),
                              minval=-bound, maxval=bound, dtype=jnp.float32)
    b_ih = jax.random.uniform(k3, (4 * in_channels,),
                              minval=-bound, maxval=bound, dtype=jnp.float32)
    b_hh = jax.random.uniform(k4, (4 * in_channels,),
                              minval=-bound, maxval=bound, dtype=jnp.float32)

    # ---- test 1: small graph batch -> resident-x (VMEM-cached) kernel ------
    N, batch_size = 16, 4
    batch = jnp.repeat(jnp.arange(batch_size, dtype=jnp.int32), N // batch_size)
    x = jax.random.normal(kx, (N, in_channels), dtype=jnp.float32)
    out = set2set_pallas(x, batch, batch_size, w_ih, w_hh, b_ih, b_hh,
                         processing_steps, num_layers=num_layers)
    out = jax.block_until_ready(out)
    ref = set2set_ref(x, batch, batch_size, w_ih, w_hh, b_ih, b_hh,
                      processing_steps)
    assert out.shape == (batch_size, 2 * in_channels)
    # bf16 MXU operands (x, q, p, LSTM weights) with f32 accumulation
    assert jnp.allclose(out, ref, atol=5e-2, rtol=5e-2), (
        f"resident path: max abs err {jnp.max(jnp.abs(out - ref))}")

    # ---- test 2: forced streaming kernel, several node tiles ---------------
    sizes2 = [70, 40, 90, 60, 40]
    N2, batch_size2 = sum(sizes2), len(sizes2)
    batch2 = jnp.concatenate(
        [jnp.full((sz,), i, jnp.int32) for i, sz in enumerate(sizes2)])
    x2 = jax.random.normal(kx2, (N2, in_channels), dtype=jnp.float32)
    out2 = set2set_pallas(x2, batch2, batch_size2, w_ih, w_hh, b_ih, b_hh,
                          processing_steps, num_layers=num_layers,
                          tile_n=128, force_stream=True)
    out2 = jax.block_until_ready(out2)
    ref2 = set2set_ref(x2, batch2, batch_size2, w_ih, w_hh, b_ih, b_hh,
                       processing_steps)
    assert out2.shape == (batch_size2, 2 * in_channels)
    assert jnp.allclose(out2, ref2, atol=5e-2, rtol=5e-2), (
        f"streaming path: max abs err {jnp.max(jnp.abs(out2 - ref2))}")

    print("KERNEL_OK")
</pallas_src>

<mosaic_0001>
module attributes {stable_mosaic.version = 11 : i64} {
  func.func @_set2set_resident_kernel(%arg0: i32, %arg1: memref<1x16xi32, #tpu.memory_space<vmem>>, %arg2: memref<16x32xbf16, #tpu.memory_space<any>>, %arg3: memref<64x128xbf16, #tpu.memory_space<vmem>>, %arg4: memref<32x128xbf16, #tpu.memory_space<vmem>>, %arg5: memref<1x128xf32, #tpu.memory_space<vmem>>, %arg6: memref<4x64xf32, #tpu.memory_space<vmem>>, %arg7: memref<16x32xbf16, #tpu.memory_space<vmem>>, %arg8: memref<4x32xf32, #tpu.memory_space<vmem>>, %arg9: memref<4x32xf32, #tpu.memory_space<vmem>>, %arg10: memref<4x64xf32, #tpu.memory_space<vmem>>) attributes {dimension_semantics = [#tpu.dimension_semantics<arbitrary>], iteration_bounds = array<i64: 3>, scalar_prefetch = 0 : i64, scratch_operands = 4 : i64, tpu.core_type = #tpu.core_type<tc>, window_params = [{pipeline_mode = #tpu.pipeline_mode<synchronous>, transform_indices = @transform_0, window_bounds = array<i64: 1, 16>}, {}, {pipeline_mode = #tpu.pipeline_mode<synchronous>, transform_indices = @transform_2, window_bounds = array<i64: 64, 128>}, {pipeline_mode = #tpu.pipeline_mode<synchronous>, transform_indices = @transform_3, window_bounds = array<i64: 32, 128>}, {pipeline_mode = #tpu.pipeline_mode<synchronous>, transform_indices = @transform_4, window_bounds = array<i64: 1, 128>}, {pipeline_mode = #tpu.pipeline_mode<synchronous>, transform_indices = @transform_5, window_bounds = array<i64: 4, 64>}]} {
    %c0_i32 = arith.constant 0 : i32
    %0 = arith.cmpi eq, %arg0, %c0_i32 : i32
    %1 = arith.extui %0 : i1 to i32
    %c0_i32_0 = arith.constant 0 : i32
    %2 = arith.cmpi ne, %1, %c0_i32_0 : i32
    scf.if %2 {
      %cst_35 = arith.constant 0.000000e+00 : f32
      %70 = vector.broadcast %cst_35 : f32 to vector<4x32xf32>
      %c0_36 = arith.constant 0 : index
      %c0_37 = arith.constant 0 : index
      %71 = vector.load %arg8[%c0_36, %c0_37] : memref<4x32xf32, #tpu.memory_space<vmem>>, vector<4x32xf32>
      tpu.vector_store %arg8[%c0_36, %c0_37], %70 {strides = array<i32>} : memref<4x32xf32, #tpu.memory_space<vmem>>, vector<4x32xf32>,
      %cst_38 = arith.constant 0.000000e+00 : f32
      %72 = vector.broadcast %cst_38 : f32 to vector<4x32xf32>
      %c0_39 = arith.constant 0 : index
      %c0_40 = arith.constant 0 : index
      %73 = vector.load %arg9[%c0_39, %c0_40] : memref<4x32xf32, #tpu.memory_space<vmem>>, vector<4x32xf32>
      tpu.vector_store %arg9[%c0_39, %c0_40], %72 {strides = array<i32>} : memref<4x32xf32, #tpu.memory_space<vmem>>, vector<4x32xf32>,
      %cst_41 = arith.constant 0.000000e+00 : f32
      %74 = vector.broadcast %cst_41 : f32 to vector<4x64xf32>
      %c0_42 = arith.constant 0 : index
      %c0_43 = arith.constant 0 : index
      %75 = vector.load %arg10[%c0_42, %c0_43] : memref<4x64xf32, #tpu.memory_space<vmem>>, vector<4x64xf32>
      tpu.vector_store %arg10[%c0_42, %c0_43], %74 {strides = array<i32>} : memref<4x64xf32, #tpu.memory_space<vmem>>, vector<4x64xf32>,
      "tpu.region"() ({
        %76 = tpu.sem_alloc : memref<!tpu.dma_semaphore, #tpu.memory_space<semaphore_mem>>
        tpu.enqueue_dma source(%arg2 : memref<16x32xbf16, #tpu.memory_space<any>>) target(%arg7 : memref<16x32xbf16, #tpu.memory_space<vmem>>) target_semaphore(%76 : memref<!tpu.dma_semaphore, #tpu.memory_space<semaphore_mem>>)
        tpu.wait_dma2 semaphore(%76 : memref<!tpu.dma_semaphore, #tpu.memory_space<semaphore_mem>>) src(%arg2 : memref<16x32xbf16, #tpu.memory_space<any>>) dst(%arg7 : memref<16x32xbf16, #tpu.memory_space<vmem>>)
        tpu.yield
      }) : () -> ()
    } else {
    }
    %c0 = arith.constant 0 : index
    %c0_1 = arith.constant 0 : index
    %3 = vector.load %arg10[%c0, %c0_1] : memref<4x64xf32, #tpu.memory_space<vmem>>, vector<4x64xf32>
    %4 = arith.truncf %3 : vector<4x64xf32> to vector<4x64xbf16>
    %c0_2 = arith.constant 0 : index
    %c0_3 = arith.constant 0 : index
    %5 = vector.load %arg3[%c0_2, %c0_3] : memref<64x128xbf16, #tpu.memory_space<vmem>>, vector<64x128xbf16>
    %cst = arith.constant dense<0.000000e+00> : vector<4x128xf32>
    %6 = tpu.matmul %4, %5, %cst {dimension_numbers = #tpu.dot_dimension_numbers<[1], [0], [0], [1], [0, 0, 1, 1], [], []>} : vector<4x64xbf16>, vector<64x128xbf16>, vector<4x128xf32> -> vector<4x128xf32>
    %c0_4 = arith.constant 0 : index
    %c0_5 = arith.constant 0 : index
    %7 = vector.load %arg8[%c0_4, %c0_5] : memref<4x32xf32, #tpu.memory_space<vmem>>, vector<4x32xf32>
    %8 = arith.truncf %7 : vector<4x32xf32> to vector<4x32xbf16>
    %c0_6 = arith.constant 0 : index
    %c0_7 = arith.constant 0 : index
    %9 = vector.load %arg4[%c0_6, %c0_7] : memref<32x128xbf16, #tpu.memory_space<vmem>>, vector<32x128xbf16>
    %cst_8 = arith.constant dense<0.000000e+00> : vector<4x128xf32>
    %10 = tpu.matmul %8, %9, %cst_8 {dimension_numbers = #tpu.dot_dimension_numbers<[1], [0], [0], [1], [0, 0, 1, 1], [], []>} : vector<4x32xbf16>, vector<32x128xbf16>, vector<4x128xf32> -> vector<4x128xf32>
    %11 = arith.addf %6, %10 : vector<4x128xf32>
    %c0_9 = arith.constant 0 : index
    %c0_10 = arith.constant 0 : index
    %12 = vector.load %arg5[%c0_9, %c0_10] : memref<1x128xf32, #tpu.memory_space<vmem>>, vector<1x128xf32>
    %13 = vector.broadcast %12 : vector<1x128xf32> to vector<4x128xf32>
    %14 = arith.addf %11, %13 : vector<4x128xf32>
    %15 = vector.extract_strided_slice %14 {offsets = [0, 0], sizes = [4, 32], strides = [1, 1]} : vector<4x128xf32> to vector<4x32xf32>
    %16 = arith.negf %15 : vector<4x32xf32>
    %17 = math.exp %16 : vector<4x32xf32>
    %cst_11 = arith.constant 1.000000e+00 : f32
    %18 = vector.broadcast %cst_11 : f32 to vector<4x32xf32>
    %19 = arith.addf %18, %17 : vector<4x32xf32>
    %20 = arith.divf %18, %19 : vector<4x32xf32>
    %21 = vector.extract_strided_slice %14 {offsets = [0, 32], sizes = [4, 32], strides = [1, 1]} : vector<4x128xf32> to vector<4x32xf32>
    %22 = arith.negf %21 : vector<4x32xf32>
    %23 = math.exp %22 : vector<4x32xf32>
    %cst_12 = arith.constant 1.000000e+00 : f32
    %24 = vector.broadcast %cst_12 : f32 to vector<4x32xf32>
    %25 = arith.addf %24, %23 : vector<4x32xf32>
    %26 = arith.divf %24, %25 : vector<4x32xf32>
    %27 = vector.extract_strided_slice %14 {offsets = [0, 64], sizes = [4, 32], strides = [1, 1]} : vector<4x128xf32> to vector<4x32xf32>
    %28 = math.tanh %27 : vector<4x32xf32>
    %29 = vector.extract_strided_slice %14 {offsets = [0, 96], sizes = [4, 32], strides = [1, 1]} : vector<4x128xf32> to vector<4x32xf32>
    %30 = arith.negf %29 : vector<4x32xf32>
    %31 = math.exp %30 : vector<4x32xf32>
    %cst_13 = arith.constant 1.000000e+00 : f32
    %32 = vector.broadcast %cst_13 : f32 to vector<4x32xf32>
    %33 = arith.addf %32, %31 : vector<4x32xf32>
    %34 = arith.divf %32, %33 : vector<4x32xf32>
    %c0_14 = arith.constant 0 : index
    %c0_15 = arith.constant 0 : index
    %35 = vector.load %arg9[%c0_14, %c0_15] : memref<4x32xf32, #tpu.memory_space<vmem>>, vector<4x32xf32>
    %36 = arith.mulf %26, %35 : vector<4x32xf32>
    %37 = arith.mulf %20, %28 : vector<4x32xf32>
    %38 = arith.addf %36, %37 : vector<4x32xf32>
    %39 = math.tanh %38 : vector<4x32xf32>
    %40 = arith.mulf %34, %39 : vector<4x32xf32>
    %c0_16 = arith.constant 0 : index
    %c0_17 = arith.constant 0 : index
    %41 = vector.load %arg9[%c0_16, %c0_17] : memref<4x32xf32, #tpu.memory_space<vmem>>, vector<4x32xf32>
    tpu.vector_store %arg9[%c0_16, %c0_17], %38 {strides = array<i32>} : memref<4x32xf32, #tpu.memory_space<vmem>>, vector<4x32xf32>,
    %c0_18 = arith.constant 0 : index
    %c0_19 = arith.constant 0 : index
    %42 = vector.load %arg8[%c0_18, %c0_19] : memref<4x32xf32, #tpu.memory_space<vmem>>, vector<4x32xf32>
    tpu.vector_store %arg8[%c0_18, %c0_19], %40 {strides = array<i32>} : memref<4x32xf32, #tpu.memory_space<vmem>>, vector<4x32xf32>,
    %c0_20 = arith.constant 0 : index
    %c0_21 = arith.constant 0 : index
    %43 = vector.load %arg7[%c0_20, %c0_21] : memref<16x32xbf16, #tpu.memory_space<vmem>>, vector<16x32xbf16>
    %c0_22 = arith.constant 0 : index
    %c0_23 = arith.constant 0 : index
    %44 = vector.load %arg1[%c0_22, %c0_23] : memref<1x16xi32, #tpu.memory_space<vmem>>, vector<1x16xi32>
    %45 = tpu.iota {dimensions = array<i32: 0>} : vector<4x16xi32>
    %46 = vector.broadcast %44 : vector<1x16xi32> to vector<4x16xi32>
    %47 = arith.cmpi eq, %46, %45 : vector<4x16xi32>
    %48 = arith.truncf %40 : vector<4x32xf32> to vector<4x32xbf16>
    "tpu.trace_start"() <{level = 10 : i32, message = "bc,nc->bn"}> : () -> ()
    %cst_24 = arith.constant dense<0.000000e+00> : vector<4x16xf32>
    %49 = tpu.matmul %48, %43, %cst_24 {dimension_numbers = #tpu.dot_dimension_numbers<[1], [1], [0], [0], [0, 0, 1, 0], [], []>} : vector<4x32xbf16>, vector<16x32xbf16>, vector<4x16xf32> -> vector<4x16xf32>
    %cst_25 = arith.constant -1.000000e+30 : f32
    "tpu.trace_stop"() : () -> ()
    %50 = vector.broadcast %cst_25 : f32 to vector<4x16xf32>
    %51 = arith.select %47, %49, %50 : vector<4x16xi1>, vector<4x16xf32>
    %cst_26 = arith.constant dense<0xFF800000> : vector<4xf32>
    %52 = vector.multi_reduction <maximumf>, %51, %cst_26 [1] : vector<4x16xf32> to vector<4xf32>
    %53 = vector.shape_cast %52 : vector<4xf32> to vector<4x1xf32>
    %54 = vector.broadcast %53 : vector<4x1xf32> to vector<4x16xf32>
    %55 = arith.subf %51, %54 : vector<4x16xf32>
    %56 = math.exp %55 : vector<4x16xf32>
    %cst_27 = arith.constant 0.000000e+00 : f32
    %57 = vector.broadcast %cst_27 : f32 to vector<4x16xf32>
    %58 = arith.select %47, %56, %57 : vector<4x16xi1>, vector<4x16xf32>
    %cst_28 = arith.constant dense<0.000000e+00> : vector<4xf32>
    %59 = vector.multi_reduction <add>, %58, %cst_28 [1] : vector<4x16xf32> to vector<4xf32>
    %60 = vector.shape_cast %59 : vector<4xf32> to vector<4x1xf32>
    %61 = arith.truncf %58 : vector<4x16xf32> to vector<4x16xbf16>
    %cst_29 = arith.constant dense<0.000000e+00> : vector<4x32xf32>
    %62 = tpu.matmul %61, %43, %cst_29 {dimension_numbers = #tpu.dot_dimension_numbers<[1], [0], [0], [1], [0, 0, 1, 1], [], []>} : vector<4x16xbf16>, vector<16x32xbf16>, vector<4x32xf32> -> vector<4x32xf32>
    %cst_30 = arith.constant 1.000000e-16 : f32
    %63 = vector.broadcast %cst_30 : f32 to vector<4x1xf32>
    %64 = arith.addf %60, %63 : vector<4x1xf32>
    %65 = vector.broadcast %64 : vector<4x1xf32> to vector<4x32xf32>
    %66 = arith.divf %62, %65 : vector<4x32xf32>
    %67 = tpu.concatenate %40, %66 in 1 : vector<4x32xf32>, vector<4x32xf32> -> vector<4x64xf32>
    %c0_31 = arith.constant 0 : index
    %c0_32 = arith.constant 0 : index
    %68 = vector.load %arg10[%c0_31, %c0_32] : memref<4x64xf32, #tpu.memory_space<vmem>>, vector<4x64xf32>
    tpu.vector_store %arg10[%c0_31, %c0_32], %67 {strides = array<i32>} : memref<4x64xf32, #tpu.memory_space<vmem>>, vector<4x64xf32>,
    %c0_33 = arith.constant 0 : index
    %c0_34 = arith.constant 0 : index
    %69 = vector.load %arg6[%c0_33, %c0_34] : memref<4x64xf32, #tpu.memory_space<vmem>>, vector<4x64xf32>
    tpu.vector_store %arg6[%c0_33, %c0_34], %67 {strides = array<i32>} : memref<4x64xf32, #tpu.memory_space<vmem>>, vector<4x64xf32>,
    return
  }
  func.func @transform_0(%arg0: i32) -> (i32, i32) {
    %c0_i32 = arith.constant 0 : i32
    %c0_i32_0 = arith.constant 0 : i32
    %c0_i32_1 = arith.constant 0 : i32
    return %c0_i32, %c0_i32_0 : i32, i32
  }
  func.func @transform_2(%arg0: i32) -> (i32, i32) {
    %c0_i32 = arith.constant 0 : i32
    %c0_i32_0 = arith.constant 0 : i32
    %c0_i32_1 = arith.constant 0 : i32
    return %c0_i32, %c0_i32_0 : i32, i32
  }
  func.func @transform_3(%arg0: i32) -> (i32, i32) {
    %c0_i32 = arith.constant 0 : i32
    %c0_i32_0 = arith.constant 0 : i32
    %c0_i32_1 = arith.constant 0 : i32
    return %c0_i32, %c0_i32_0 : i32, i32
  }
  func.func @transform_4(%arg0: i32) -> (i32, i32) {
    %c0_i32 = arith.constant 0 : i32
    %c0_i32_0 = arith.constant 0 : i32
    %c0_i32_1 = arith.constant 0 : i32
    return %c0_i32, %c0_i32_0 : i32, i32
  }
  func.func @transform_5(%arg0: i32) -> (i32, i32) {
    %c0_i32 = arith.constant 0 : i32
    %c0_i32_0 = arith.constant 0 : i32
    %c0_i32_1 = arith.constant 0 : i32
    return %c0_i32, %c0_i32_0 : i32, i32
  }
}

</mosaic_0001>

<bundles_post_ra>
// kernel: tpu_custom_call.1
= control target key start
LH: loop header
LB: loop body
LE: loop exit
PB: predicated region body
PF: predicated region fallthrough
CT: control target
= control target key end

     0   :  { %10 = vsyncpa [#allocation7], 0  ;;  %s1145_s0 = inlined_call_operand.hbm [shape: s32[1,16], index: 0, kind: input, shape index: {}]   ;;  %s1146_s1 = inlined_call_operand.hbm [shape: bf16[16,32], index: 1, kind: input, shape index: {}]   ;;  %s1147_s2 = inlined_call_operand.hbm [shape: bf16[64,128], index: 2, kind: input, shape index: {}]   ;;  %s1148_s3 = inlined_call_operand.hbm [shape: bf16[32,128], index: 3, kind: input, shape index: {}]   ;;  %s1149_s4 = inlined_call_operand.vmem [shape: f32[1,128], index: 4, kind: input, shape index: {}]   ;;  %s1150_s5 = inlined_call_operand.hbm [shape: f32[4,64], index: 5, kind: output, shape index: {}]  }
   0x1   :  { %11 = vsyncpa [#allocation10], 0 }
   0x2   :  { %12 = vsyncpa [#allocation8], 0  ;;  %s953_s18 = smov 0  }
   0x3 LB: > { %s910_s19 = smov [#allocation9]   ;;  %s959_s21 = sadd.s32 4294967295, %s908_s18   ;;  %s908_s18 = sphi %s953_s18, %s18_s18  }
   0x4   : > { %s151_s20 = sshll.u32 %s910_s19, 4  ;;  %p613_p0 = scmp.ge.s32.totalorder %s908_s18, 1  ;;  %s969_s20 = int_to_ptr.vmem [resolvable:$true] %s151_s20 }
   0x5   : > { %p128_p1 = scmp.lt.s32.totalorder %s908_s18, 4  ;;  %p709_p3 = scmp.eq.s32.totalorder %s959_s21, 0 }
   0x6   : > { %s911_s23 = smov [#allocation6]   ;;  %s912_s26 = smov [#allocation11]  }
   0x7   : > { %p965_p4 = pnand %p613_p0, %p128_p1  ;;  %s141_s24 = sshll.u32 %s911_s23, 4  ;;  %s979_s24 = int_to_ptr.vmem [resolvable:$true] %s141_s24 }
   0x8   : > { %s164_s27 = sshll.u32 %s912_s26, 4  ;;  %s756_s30 = scalar_lea.hbm %s1147_s2, 512  ;;  %s981_s27 = int_to_ptr.vmem [resolvable:$true] %s164_s27 }
   0x9   : > { %p699_p5 = pneg %p965_p4  ;;  %p757_p7 = scmp.ne.s32.totalorder %s1147_s2, %s756_s30 }
   0xa   : > { %p763_p11 = scmp.lt.u32.totalorder %s756_s30, %s1147_s2 }
   0xb   : > { %p975_p6 = pnand %p709_p3, %p699_p5 }
   0xd   : > { %p991_p8 = pneg %p975_p6 }
   0xf   : > { %p759_p9 = pnand %p991_p8, %p757_p7 }
  0x11   : > { %p760_p10 = pneg %p759_p9 }
  0x13   : > { %p765_p12 = pnand %p763_p11, %p760_p10 }
  0x15   : > { %768 = shalt.err (!%p765_p12)
}
  0x16   : > { %s769_s11 = scalar_lea.vmem %s969_s20, 512  ;;  %p777_p5 = scmp.lt.s32.totalorder %s969_s20, %s969_s20 }
  0x17   : > { %p770_p13 = scmp.ne.s32.totalorder %s969_s20, %s769_s11  ;;  %p778_p2 = scmp.lt.s32.totalorder %s769_s11, %s769_s11 }
  0x19   : > { %p772_p0 = pnand %p770_p13, %p991_p8  ;;  %p779_p7 = por %p778_p2, %p777_p5 }
  0x1b   : > { %p773_p1 = pneg %p772_p0 }
  0x1d   : > { %p780_p9 = pnand %p779_p7, %p773_p1 }
  0x1f   : > { %783 = shalt.err (!%p780_p9)
}
  0x20   : > { %s913_s12 = smov 64   ;;  %s914_s13 = smov 4  }
  0x21   : > { %705 = dma.hbm_to_vmem [thread:$0]  (!%p975_p6), %s1147_s2, 512, %s969_s20, [#allocation10], %s913_s12, %s913_s12, %s914_s13  }
  0x22   : > { %s784_s19 = scalar_lea.hbm %s1145_s0, 16 }
  0x23   : > { %p785_p2 = scmp.ne.s32.totalorder %s1145_s0, %s784_s19  ;;  %p791_p12 = scmp.lt.u32.totalorder %s784_s19, %s1145_s0 }
  0x25   : > { %p787_p10 = pnand %p785_p2, %p991_p8 }
  0x27   : > { %p788_p11 = pneg %p787_p10 }
  0x29   : > { %p793_p13 = pnand %p791_p12, %p788_p11 }
  0x2b   : > { %796 = shalt.err (!%p793_p13)
}
  0x2c   : > { %s797_s20 = scalar_lea.vmem %s979_s24, 16  ;;  %s804_s30 = scalar_lea.vmem %s979_s24, 32 }
  0x2d   : > { %p798_p0 = scmp.ne.s32.totalorder %s979_s24, %s797_s20  ;;  %p805_p7 = scmp.lt.s32.totalorder %s979_s24, %s979_s24 }
  0x2e   : > { %p806_p9 = scmp.lt.s32.totalorder %s804_s30, %s797_s20 }
  0x2f   : > { %p800_p1 = pnand %p798_p0, %p991_p8 }
  0x30   : > { %p807_p2 = por %p806_p9, %p805_p7 }
  0x31   : > { %p801_p5 = pneg %p800_p1 }
  0x33   : > { %p808_p10 = pnand %p807_p2, %p801_p5 }
  0x35   : > { %811 = shalt.err (!%p808_p10)
}
  0x36   : > { %702 = dma.hbm_to_vmem [thread:$0]  (!%p975_p6), %s1145_s0, 16, %s979_s24, [#allocation7]  }
  0x37   : > { %s812_s11 = scalar_lea.hbm %s1148_s3, 256 }
  0x38   : > { %p813_p11 = scmp.ne.s32.totalorder %s1148_s3, %s812_s11  ;;  %p819_p0 = scmp.lt.u32.totalorder %s812_s11, %s1148_s3 }
  0x3a   : > { %p815_p12 = pnand %p813_p11, %p991_p8 }
  0x3c   : > { %p816_p13 = pneg %p815_p12 }
  0x3e   : > { %p821_p1 = pnand %p819_p0, %p816_p13 }
  0x40   : > { %824 = shalt.err (!%p821_p1)
}
  0x41   : > { %s825_s24 = scalar_lea.vmem %s981_s27, 256  ;;  %p833_p2 = scmp.lt.s32.totalorder %s981_s27, %s981_s27 }
  0x42   : > { %p826_p5 = scmp.ne.s32.totalorder %s981_s27, %s825_s24  ;;  %p834_p10 = scmp.lt.s32.totalorder %s825_s24, %s825_s24 }
  0x44   : > { %p828_p7 = pnand %p826_p5, %p991_p8  ;;  %p835_p11 = por %p834_p10, %p833_p2 }
  0x46   : > { %p829_p9 = pneg %p828_p7 }
  0x48   : > { %p836_p12 = pnand %p835_p11, %p829_p9 }
  0x4a   : > { %839 = shalt.err (!%p836_p12)
}
  0x4b   : > { %708 = dma.hbm_to_vmem [thread:$0]  (!%p975_p6), %s1148_s3, 256, %s981_s27, [#allocation10], %s913_s12, %s913_s12, %s914_s13  }
  0x4c   : > { %183 = sbr.rel (%p965_p4) target bundleno = 1556 (0x614), region = 36 }
  0x53   : > { %893 = dma.done.wait (%p709_p3), [#allocation7], 16  }
  0x54   : > { %895 = vsyncadd (%p709_p3), [#allocation7], 4294967280 }
  0x55   : > { %897 = dma.done.wait (%p709_p3), [#allocation10], 768  }
  0x56   : > { %899 = vsyncadd (%p709_p3), [#allocation10], 4294966528  ;;  %p1154_p8 = scmp.ne.s32.totalorder %s959_s21, 0 }
  0x57   : > { %vm212_vm0 = vcmask (!%p1154_p8), 257024   ;;  %vm215_vm1 = vcmask (!%p1154_p8), 519168   ;;  %v915_v0 = vmov (!%p1154_p8), 0.0  }
  0x58   : > { %211 = sbr.rel (%p1154_p8) target bundleno = 113 (0x71), region = 52  ;;  %213 = vst.msk [vmem:[#allocation3] sm:$0xf] (!%p1154_p8), %vm212_vm0, %v915_v0  ;;  %214 = vst.msk [vmem:[#allocation4] sm:$0xf] (!%p1154_p8), %vm212_vm0, %v915_v0 }
  0x59   : > { %216 = vst.msk [vmem:[#allocation5] sm:$0xf] (!%p1154_p8), %vm215_vm1, %v915_v0 }
  0x5f   : > { %s916_s22 = smov [#allocation2]   ;;  %s840_s12 = scalar_lea.hbm %s1146_s1, 128 }
  0x60   : > { %s224_s25 = sshll.u32 %s916_s22, 4  ;;  %p841_p3 = scmp.ne.s32.totalorder %s1146_s1, %s840_s12  ;;  %s225_s25 = int_to_ptr.vmem [resolvable:$true] %s224_s25 }
  0x61   : > { %p844_p4 = scmp.lt.u32.totalorder %s840_s12, %s1146_s1 }
  0x63   : > { %p846_p6 = pnand %p844_p4, %p841_p3 }
  0x65   : > { %849 = shalt.err (!%p846_p6)  }
  0x66   : > { %s850_s20 = scalar_lea.vmem %s225_s25, 128  ;;  %p855_p0 = scmp.lt.s32.totalorder %s225_s25, %s225_s25 }
  0x67   : > { %p851_p13 = scmp.ne.s32.totalorder %s225_s25, %s850_s20  ;;  %p856_p1 = scmp.lt.s32.totalorder %s850_s20, %s850_s20 }
  0x69   : > { %p857_p5 = por %p856_p1, %p855_p0 }
  0x6b   : > { %p858_p7 = pnand %p857_p5, %p851_p13 }
  0x6d   : > { %861 = shalt.err (!%p858_p7)  }
  0x6e   : > { %227 = dma.hbm_to_vmem [thread:$0]  %s1146_s1, 128, %s225_s25, [#allocation13] }
  0x6f   : > { %900 = dma.done.wait [#allocation13], 128 }
  0x70   : > { %901 = vsyncadd [#allocation13], 4294967168 }
  0x71 PF: > { %v738_v1 = vld [vmem:[#allocation9] sm:$0xff]   ;;  %v917_v2 = vmov 0.0   ;;  %v739_v3 = vld [vmem:[#allocation9 + $0x8] sm:$0xff]   ;;  %vm918_vm2 = vmmov 0   ;;  %v242_v6 = vld [vmem:[#allocation3] sm:$0xf]  ;;  %v422_v42 = vlaneseq }
  0x72   : > { %659 = vmatprep.subr.bf16.mxu1 %v917_v2  ;;  %651 = vmatprep.subr.bf16.mxu0 %v917_v2  ;;  %v740_v4 = vld [vmem:[#allocation11] sm:$0xff]   ;;  %v742_v5 = vld [vmem:[#allocation11 + $0x8] sm:$0xff]   ;;  %v741_v7 = vld [vmem:[#allocation9 + $0x10] sm:$0xff]   ;;  %v243_v8 = vpack.c.bf16 %v242_v6, %v242_v6  ;;  %vm260_vm3 = vcmask 261120   ;;  %vm328_vm4 = vcmask 523264   ;;  %s919_s10 = smov 64  }
  0x73   : > { %660 = vmatpush3.bf16.msra.mxu1 %v738_v1  ;;  %655 = vmatprep.mubr.msk.bf16.mxu0 %vm918_vm2, %v917_v2  ;;  %v743_v9 = vld [vmem:[#allocation9 + $0x18] sm:$0xff]   ;;  %v630_v17 = vld [vmem:[%s1149_s4] ss:$0 sm:$0xff]  ;;  %s920_s11 = smov 32   ;;  %v423_v43 = vshrl.u32 %v422_v42, 7  ;;  %vm480_vm6 = vcmask 125952  }
  0x74   : > { %661 = vmatprep.subr.bf16.mxu1 %v917_v2  ;;  %667 = vmatprep.mubr.msk.bf16.mxu1 %vm918_vm2, %v917_v2  ;;  %v232_v10 = vld [vmem:[#allocation5] sm:$0xf]  ;;  %v387_v24 = vld [vmem:[#allocation4] sm:$0xf]  ;;  %v420_v35 = vld [vmem:[#allocation2] sm:$0xff]  ;;  %vm492_vm7 = vcmask 130048  }
  0x75   : > { %652 = vmatpush3.bf16.msra.mxu0 %v740_v4  ;;  %v233_v11 = vpack.c.bf16 %v232_v10, %v232_v10  ;;  %v437_v36 = vsel %vm260_vm3, %v420_v35, 0  ;;  %v632_v44 = vld [vmem:[#allocation6] ss:$0 sm:$0xff]  ;;  %vm413_vm8 = vcmask 257024   ;;  %s921_s14 = smov 96   ;;  %s922_s15 = smov [#allocation12]  }
  0x76   : > { %653 = vmatprep.subr.bf16.mxu0 %v917_v2  ;;  %vm428_vm5 = vcmp.eq.s32.totalorder %v632_v44, %v423_v43  ;;  %s554_s16 = sshll.u32 %s922_s15, 4  ;;  %vm544_vm9 = vcmask 519168   ;;  %p715_p9 = scmp.eq.s32.totalorder %s959_s21, 2  ;;  %s555_s16 = int_to_ptr.vmem [resolvable:$true] %s554_s16 }
  0x77   : > { %662 = vmatpush3.bf16.msra.mxu1 %v739_v3  ;;  %s862_s17 = scalar_lea.vmem %s555_s16, 64  ;;  %p869_p12 = scmp.lt.s32.totalorder %s555_s16, %s555_s16 }
  0x78   : > { %663 = vmatprep.subr.bf16.mxu1 %v917_v2  ;;  %p863_p2 = scmp.ne.s32.totalorder %s555_s16, %s862_s17  ;;  %p870_p8 = scmp.lt.s32.totalorder %s862_s17, %s862_s17 }
  0x79   : > { %654 = vmatpush3.bf16.msra.mxu0 %v742_v5 }
  0x7a   : > { %671 = vmatprep.subr.bf16.mxu0 %v917_v2  ;;  %p864_p10 = pnand %p863_p2, %p715_p9  ;;  %p871_p3 = por %p870_p8, %p869_p12 }
  0x7b   : > { %664 = vmatpush3.bf16.msra.mxu1 %v741_v7 }
  0x7c   : > { %665 = vmatprep.subr.bf16.mxu1 %v917_v2  ;;  %656 = vmatmul.mubr.msk.bf16.vlgmr.msra.gmra.mrb[0].mxu0 %vm260_vm3, %v243_v8  ;;  %p865_p11 = pneg %p864_p10 }
  0x7d   : > { %673 = vmatprep.mubr.msk.bf16.mxu0 %vm918_vm2, %v917_v2 }
  0x7e   : > { %p872_p4 = pnand %p871_p3, %p865_p11 }
  0x7f   : > { %666 = vmatpush3.bf16.msra.mxu1 %v743_v9 }
  0x82   : > { %668 = vmatmul.mubr.msk.bf16.vlgmr.msra.gmra.mrb[0].mxu1 %vm328_vm4, %v233_v11  ;;  %672 = vmatpush3.bf16.xpose.msra.mxu0 %v437_v36 }
  0x83   : > { %677 = vmatprep.subr.bf16.mxu0 %v917_v2 }
 0x14f   : > { %v298_v12 = vpop.f32.mrb[0].mxu0 }
 0x150   : > { %v657_v13 = vpop.f32.mrb[1].mxu0 }
 0x151   : > { %v301_v14 = vpop.f32.mrb[2].mxu0 }
 0x152   : > { %v658_v15 = vpop.f32.mrb[3].mxu0 }
 0x155   : > { %v366_v16 = vpop.f32.mrb[0].mxu1 }
 0x156   : > { %v367_v18 = vadd.f32 %v366_v16, %v298_v12  ;;  %v669_v19 = vpop.f32.mrb[1].mxu1 }
 0x157   : > { %v369_v20 = vpop.f32.mrb[2].mxu1 }
 0x158   : > { %v379_v21 = vadd.f32 %v630_v17, %v367_v18  ;;  %v670_v22 = vpop.f32.mrb[3].mxu1 }
 0x15a   : > { %744 = vtanh.f32 %v379_v21  ;;  %v631_v25 = vmul.f32 -1.442695, %v379_v21 }
 0x15c   : > { %746 = vpow2.f32 %v631_v25 }
 0x164   : > { %v745_v23 = vpop.eup %744 }
 0x165   : > { %394 = vrot.lane.b32.xlu0 %v745_v23, %s919_s10 }
 0x166   : > { %v747_v26 = vpop.eup %746 }
 0x167   : > { %v383_v27 = vadd.f32 1.0, %v747_v26 }
 0x169   : > { %389 = vrot.lane.b32.xlu0 %v387_v24, %s920_s11  ;;  %748 = vrcp.f32 %v383_v27 }
 0x173   : > { %v749_v28 = vpop.eup %748 }
 0x1d7   : > { %v395_v29 = vpop.permute.xlu0 %394 }
 0x1d8   : > { %v397_v30 = vmul.f32 %v749_v28, %v395_v29 }
 0x1da   : > { %399 = vrot.lane.b32.xlu1 %v397_v30, %s920_s11 }
 0x1db   : > { %v390_v31 = vpop.permute.xlu0 %389 }
 0x1dc   : > { %v392_v32 = vmul.f32 %v749_v28, %v390_v31 }
 0x24c   : > { %v400_v33 = vpop.permute.xlu1 %399 }
 0x24d   : > { %v402_v34 = vadd.f32 %v400_v33, %v392_v32 }
 0x24f   : > { %750 = vtanh.f32 %v402_v34 }
 0x259   : > { %v751_v37 = vpop.eup %750 }
 0x25a   : > { %405 = vrot.lane.b32.xlu1 %v751_v37, %s919_s10 }
 0x2cc   : > { %v406_v38 = vpop.permute.xlu1 %405 }
 0x2cd   : > { %v408_v39 = vmul.f32 %v749_v28, %v406_v38 }
 0x2cf   : > { %v429_v40 = vpack.c.bf16 %v408_v39, %v408_v39 }
 0x2d1   : > { %431 = vrot.lane.b32.xlu0 %v429_v40, %s920_s11 }
 0x343   : > { %v432_v41 = vpop.permute.xlu0 %431 }
 0x344   : > { %674 = vmatmul.mubr.msk.bf16.vlgmr.msra.gmra.mrb[4].mxu0 %vm260_vm3, %v432_v41 }
 0x345   : > { %678 = vmatpush3.bf16.msra.mxu0 %v420_v35  ;;  %679 = vmatprep.mubr.msk.bf16.mxu0 %vm918_vm2, %v917_v2 }
 0x417   : > { %v473_v45 = vpop.f32.mrb[4].mxu0 }
 0x418   : > { %v479_v46 = vsel %vm428_vm5, %v473_v45, -1e+30  ;;  %v675_v47 = vpop.f32.mrb[5].mxu0 }
 0x419   : > { %v476_v48 = vpop.f32.mrb[6].mxu0  ;;  %v481_v49 = vsel %vm480_vm6, %v479_v46, -inf }
 0x41a   : > { %482 = vmax.xlane.f32.xlu1 %v481_v49  ;;  %v676_v50 = vpop.f32.mrb[7].mxu0 }
 0x4a7   : > { %v483_v51 = vpop.xlane.xlu1 %482 }
 0x4a8   : > { %v484_v52 = vsub.f32 %v479_v46, %v483_v51 }
 0x4aa   : > { %v485_v53 = vmul.f32 1.442695, %v484_v52 }
 0x4ac   : > { %752 = vpow2.f32 %v485_v53 }
 0x4b6   : > { %v753_v54 = vpop.eup %752 }
 0x4b7   : > { %v487_v55 = vsel %vm428_vm5, %v753_v54, 0.0 }
 0x4b8   : > { %v488_v56 = vsel %vm480_vm6, %v487_v55, 0.0  ;;  %v491_v57 = vpack.c.bf16 %v487_v55, %v487_v55 }
 0x4b9   : > { %489 = vadd.xlane.f32.xlu0 %v488_v56 }
 0x4ba   : > { %680 = vmatmul.mubr.msk.bf16.vlgmr.msra.gmra.mrb[8].mxu0 %vm492_vm7, %v491_v57 }
 0x4cf   : > { %416 = vrot.lane.b32.xlu0 %v408_v39, %s920_s11 }
 0x546   : > { %v490_v58 = vpop.xlane.xlu0 %489 }
 0x547   : > { %v536_v60 = vadd.f32 1e-16, %v490_v58 }
 0x549   : > { %754 = vrcp.f32 %v536_v60 }
 0x54a   : > { %v417_v59 = vpop.permute.xlu0 %416 }
 0x54b   : > { %419 = vst.msk [vmem:[#allocation3] sm:$0xf] %vm413_vm8, %v417_v59 }
 0x553   : > { %v755_v61 = vpop.eup %754 }
 0x58d   : > { %v530_v62 = vpop.f32.mrb[8].mxu0 }
 0x58e   : > { %v538_v63 = vmul.f32 %v755_v61, %v530_v62  ;;  %v681_v0 = vpop.f32.mrb[9].mxu0 }
 0x58f   : > { %v533_v1 = vpop.f32.mrb[10].mxu0 }
 0x590   : > { %540 = vrot.lane.b32.xlu1 %v538_v63, %s920_s11  ;;  %v682_v2 = vpop.f32.mrb[11].mxu0 }
 0x594   : > { %410 = vrot.lane.b32.xlu1 %v402_v34, %s921_s14 }
 0x602   : > { %v541_v3 = vpop.permute.xlu1 %540 }
 0x603   : > { %v543_v4 = vsel %vm260_vm3, %v417_v59, %v541_v3 }
 0x604   : > { %545 = vst.msk [vmem:[#allocation5] sm:$0xf] %vm544_vm9, %v543_v4  ;;  %546 = vst.msk [vmem:[#allocation12] sm:$0xf] %vm544_vm9, %v543_v4 }
 0x605   : > { %875 = shalt.err (!%p872_p4)
}
 0x606   : > { %s876_s23 = scalar_lea.hbm %s1150_s5, 64 }
 0x607   : > { %p877_p6 = scmp.ne.s32.totalorder %s1150_s5, %s876_s23  ;;  %p882_p1 = scmp.lt.u32.totalorder %s876_s23, %s1150_s5 }
 0x609   : > { %p878_p13 = pnand %p877_p6, %p715_p9 }
 0x60b   : > { %p879_p0 = pneg %p878_p13 }
 0x60d   : > { %p884_p5 = pnand %p882_p1, %p879_p0 }
 0x60f   : > { %887 = shalt.err (!%p884_p5)
}
 0x610   : > { %696 = dma.vmem_to_hbm [thread:$0]  (%p715_p9), %s555_s16, 64, %s1150_s5, [#allocation8]   ;;  %v411_v5 = vpop.permute.xlu1 %410 }
 0x611   : > { %414 = vst.msk [vmem:[#allocation4] sm:$0xf] %vm413_vm8, %v411_v5 }
 0x612   : > { %903 = dma.done.wait (%p715_p9), [#allocation8], 64  }
 0x613   : > { %905 = vsyncadd (%p715_p9), [#allocation8], 4294967232 }
 0x614 PF: > { %s18_s18 = sadd.s32 1, %s908_s18  }
 0x615   : > { %p15_p7 = scmp.ge.s32.totalorder %s18_s18, 5  }
 0x617   :  { %17 = sbr.rel (!%p15_p7) target bundleno = 3 (0x3), region = 82 }
 0x61e   :  { %567 = vsyncpa [#allocation7], 1 }
 0x61f   :  { %569 = vsyncpa [#allocation7 + $0x1], 1 }
 0x620   :  { %570 = vsyncpa [#allocation10], 1 }
 0x621   :  { %571 = vsyncpa [#allocation8], 1 }
 0x622   :  { %573 = vsyncpa [#allocation8 + $0x1], 1 }

</bundles_post_ra>
